<compile_context>
chip_gen: v7x
topology: tpu7x:2x2x1
jax: 0.10.0
libtpu: 0.0.40
codegen_flags: <defaults>
</compile_context>

<pallas_src>
from functools import partial

import jax
import jax.numpy as jnp
from jax.experimental import pallas as pl
from jax.experimental.pallas import tpu as pltpu


def _cdiv(a: int, b: int) -> int:
    return -(-a // b)


def _round_up(x: int, m: int) -> int:
    return _cdiv(x, m) * m


# Rough polynomial/range-reduction cost per sin/cos element (advisory only).
_TRANSCENDENTAL_FLOPS = 24


# --------------------------------------------------------------------------
# Kernels
# --------------------------------------------------------------------------
def _split_halves_kernel(freq_ref, t_ref, out_ref, *, half: int):
    """half % 128 == 0.  freq_ref:(1,half) f32, t_ref:(TB,1) f32, out_ref:(TB,2*half)."""
    phase = t_ref[...] * freq_ref[...]                     # (TB, half), lane-dense
    out_ref[:, :half] = jnp.sin(phase).astype(out_ref.dtype)
    out_ref[:, half:] = jnp.cos(phase).astype(out_ref.dtype)


def _packed_select_kernel(freq_ref, t_ref, out_ref, *, channels: int, half: int):
    """128 % channels == 0 (channels is a power of two).  k=128//channels batch
    rows packed per output row.  freq_ref:(1,128), t_ref:(TBp,128), out_ref:(TBp,128)."""
    phase = t_ref[...] * freq_ref[...]                     # (TBp, 128), lane-dense
    lane = jax.lax.broadcasted_iota(jnp.int32, (1, phase.shape[-1]), 1)
    is_sin = jnp.bitwise_and(lane, channels - 1) < half    # lane % C < half (C pow2)
    out = jnp.where(is_sin, jnp.sin(phase), jnp.cos(phase))
    out_ref[...] = out.astype(out_ref.dtype)


def _select_kernel(freq_ref, t_ref, out_ref, *, half: int):
    """Generic fallback.  freq_ref:(1,C) (inv_freq tiled twice), t_ref:(TB,1)."""
    phase = t_ref[...] * freq_ref[...]                     # (TB, C)
    lane = jax.lax.broadcasted_iota(jnp.int32, (1, phase.shape[-1]), 1)
    out = jnp.where(lane < half, jnp.sin(phase), jnp.cos(phase))
    out_ref[...] = out.astype(out_ref.dtype)


# --------------------------------------------------------------------------
# Tiling helper
# --------------------------------------------------------------------------
def _choose_tiling(rows: int, block_b: int):
    """Return (tile_rows, padded_rows).  Single block when it fits; otherwise
    8-aligned tiles with an even block count so v7x's two TensorCores get a
    balanced grid (no-op on single-TC v5e/v6e)."""
    if rows <= block_b:
        return rows, rows
    nblk = _cdiv(rows, block_b)
    if nblk % 2:
        nblk += 1
    tb = _round_up(_cdiv(rows, nblk), 8)
    return tb, _round_up(rows, tb)


# --------------------------------------------------------------------------
# Wrapper
# --------------------------------------------------------------------------
def time_embedding(
    t: jax.Array,
    channels: int,
    embed_size: int = 0,            # unused in forward (kept for module parity)
    *,
    out_dtype=jnp.float32,
    block_b: int = 2048,
    use_pallas=None,                # None -> auto-dispatch on problem size
) -> jax.Array:
    """JAX/Pallas equivalent of TimeEmbedding(channels, embed_size).forward(t).

    t: (B,) timesteps.  Returns (B, channels, 1) in `out_dtype`.
    """
    assert channels % 2 == 0, "channels must be even"
    half = channels // 2
    b = int(t.shape[0])

    # Tiny problems: a fused XLA expression beats any pallas_call launch.
    if use_pallas is None:
        use_pallas = b * channels >= (1 << 20)
    if not use_pallas:
        return time_embedding_reference(t, channels).astype(out_dtype)

    # Trace-time constant: PyTorch's exact inv_freq formula.
    inv_freq = 1.0 / (10000.0 ** (jnp.arange(half, dtype=jnp.float32) / half))
    t_f32 = t.astype(jnp.float32)
    out_bytes = jnp.dtype(out_dtype).itemsize
    params = pltpu.CompilerParams(dimension_semantics=("parallel",))

    if half % 128 == 0:
        # ---- lane-dense split: one transcendental stream per lane ----------
        tb, rows_pad = _choose_tiling(b, block_b)
        t2d = t_f32.reshape(b, 1)
        if rows_pad != b:
            t2d = jnp.pad(t2d, ((0, rows_pad - b), (0, 0)))
        freq = inv_freq.reshape(1, half)
        n_elem = rows_pad * channels
        out = pl.pallas_call(
            partial(_split_halves_kernel, half=half),
            out_shape=jax.ShapeDtypeStruct((rows_pad, channels), out_dtype),
            grid=(rows_pad // tb,),
            in_specs=[pl.BlockSpec((1, half), lambda i: (0, 0)),
                      pl.BlockSpec((tb, 1), lambda i: (i, 0))],
            out_specs=pl.BlockSpec((tb, channels), lambda i: (i, 0)),
            compiler_params=params,
            cost_estimate=pl.CostEstimate(
                flops=(1 + _TRANSCENDENTAL_FLOPS) * n_elem,
                transcendentals=n_elem,
                bytes_accessed=4 * rows_pad + 4 * half + out_bytes * n_elem),
        )(freq, t2d)
        out = out[:b]

    elif 128 % channels == 0:
        # ---- small channels: pack k = 128//C batch rows per 128-lane row ----
        k = 128 // channels
        lanes = k * channels                                 # == 128
        bp = _cdiv(b, k)
        tb, bp_pad = _choose_tiling(bp, block_b)
        b_pad = bp_pad * k
        if b_pad != b:
            t_f32 = jnp.pad(t_f32, (0, b_pad - b))
        # Each timestep repeated across its C-lane group (wrapper-side, fused by XLA).
        t_exp = jnp.repeat(t_f32.reshape(bp_pad, k), channels, axis=1)   # (bp_pad, 128)
        freq = jnp.tile(jnp.concatenate([inv_freq, inv_freq]), k).reshape(1, lanes)
        n_elem = bp_pad * lanes
        out = pl.pallas_call(
            partial(_packed_select_kernel, channels=channels, half=half),
            out_shape=jax.ShapeDtypeStruct((bp_pad, lanes), out_dtype),
            grid=(bp_pad // tb,),
            in_specs=[pl.BlockSpec((1, lanes), lambda i: (0, 0)),
                      pl.BlockSpec((tb, lanes), lambda i: (i, 0))],
            out_specs=pl.BlockSpec((tb, lanes), lambda i: (i, 0)),
            compiler_params=params,
            cost_estimate=pl.CostEstimate(
                flops=(3 + 2 * _TRANSCENDENTAL_FLOPS) * n_elem,
                transcendentals=2 * n_elem,
                bytes_accessed=4 * n_elem + 4 * lanes + out_bytes * n_elem),
        )(freq, t_exp)
        out = out.reshape(b_pad, channels)[:b]

    else:
        # ---- generic fallback (channels not a divisor of 128, half % 128 != 0)
        tb, rows_pad = _choose_tiling(b, block_b)
        t2d = t_f32.reshape(b, 1)
        if rows_pad != b:
            t2d = jnp.pad(t2d, ((0, rows_pad - b), (0, 0)))
        freq = jnp.concatenate([inv_freq, inv_freq]).reshape(1, channels)
        n_elem = rows_pad * channels
        out = pl.pallas_call(
            partial(_select_kernel, half=half),
            out_shape=jax.ShapeDtypeStruct((rows_pad, channels), out_dtype),
            grid=(rows_pad // tb,),
            in_specs=[pl.BlockSpec((1, channels), lambda i: (0, 0)),
                      pl.BlockSpec((tb, 1), lambda i: (i, 0))],
            out_specs=pl.BlockSpec((tb, channels), lambda i: (i, 0)),
            compiler_params=params,
            cost_estimate=pl.CostEstimate(
                flops=(3 + 2 * _TRANSCENDENTAL_FLOPS) * n_elem,
                transcendentals=2 * n_elem,
                bytes_accessed=4 * rows_pad + 4 * channels + out_bytes * n_elem),
        )(freq, t2d)
        out = out[:b]

    # PyTorch: pos_enc.unsqueeze(-1) -> (B, channels, 1)
    return out[..., None]


def time_embedding_reference(t, channels):
    """Pure-jnp reference (also the dispatch target for tiny problems)."""
    half = channels // 2
    inv_freq = 1.0 / (10000.0 ** (jnp.arange(half, dtype=jnp.float32) / half))
    sinusoid = t.astype(jnp.float32)[:, None] * inv_freq[None, :]
    pos_enc = jnp.concatenate([jnp.sin(sinusoid), jnp.cos(sinusoid)], axis=-1)
    return pos_enc[..., None]


if __name__ == "__main__":
    key = jax.random.PRNGKey(0)
    channels = 32
    embed_size = 64  # unused by forward; kept for module parity

    # (1) Small batch, small channels -> packed 128-lane path, single block.
    t_small = jax.random.randint(key, (8,), 0, 1000).astype(jnp.float32)
    out = jax.block_until_ready(
        time_embedding(t_small, channels, embed_size, use_pallas=True))
    ref = time_embedding_reference(t_small, channels)
    assert out.shape == (8, channels, 1), out.shape
    assert jnp.allclose(out, ref, atol=1e-5, rtol=1e-5), "packed single-block mismatch"

    # (2) Packed path with batch tiling, padding, and an even grid (v7x balance).
    t_med = jax.random.randint(jax.random.PRNGKey(1), (2500,), 0, 1000).astype(jnp.float32)
    out = jax.block_until_ready(
        time_embedding(t_med, channels, embed_size, block_b=512, use_pallas=True))
    ref = time_embedding_reference(t_med, channels)
    assert out.shape == (2500, channels, 1), out.shape
    assert jnp.allclose(out, ref, atol=1e-5, rtol=1e-5), "packed tiled mismatch"

    # (3) Wide channels (half % 128 == 0) -> split sin/cos path, 1 stream per lane.
    t_wide = jax.random.randint(jax.random.PRNGKey(2), (8,), 0, 1000).astype(jnp.float32)
    out = jax.block_until_ready(time_embedding(t_wide, 256, embed_size, use_pallas=True))
    ref = time_embedding_reference(t_wide, 256)
    assert out.shape == (8, 256, 1), out.shape
    assert jnp.allclose(out, ref, atol=1e-5, rtol=1e-5), "split-halves mismatch"

    # (4) Awkward channel count -> generic select fallback.
    t_odd = jax.random.randint(jax.random.PRNGKey(3), (10,), 0, 1000).astype(jnp.float32)
    out = jax.block_until_ready(time_embedding(t_odd, 48, embed_size, use_pallas=True))
    ref = time_embedding_reference(t_odd, 48)
    assert out.shape == (10, 48, 1), out.shape
    assert jnp.allclose(out, ref, atol=1e-5, rtol=1e-5), "generic fallback mismatch"

    # (5) Auto dispatch: tiny problems take the fused XLA expression.
    out_auto = jax.block_until_ready(time_embedding(t_small, channels, embed_size))
    assert jnp.allclose(out_auto, time_embedding_reference(t_small, channels),
                        atol=1e-5, rtol=1e-5), "auto-dispatch mismatch"

    print("KERNEL_OK")
</pallas_src>

<mosaic_0001>
module attributes {stable_mosaic.version = 11 : i64} {
  func.func @_packed_select_kernel(%arg0: i32, %arg1: memref<1x128xf32, #tpu.memory_space<vmem>>, %arg2: memref<2x128xf32, #tpu.memory_space<vmem>>, %arg3: memref<2x128xf32, #tpu.memory_space<vmem>>) attributes {dimension_semantics = [#tpu.dimension_semantics<parallel>], iteration_bounds = array<i64: 1>, scalar_prefetch = 0 : i64, scratch_operands = 0 : i64, tpu.core_type = #tpu.core_type<tc>, window_params = [{pipeline_mode = #tpu.pipeline_mode<synchronous>, transform_indices = @transform_0, window_bounds = array<i64: 1, 128>}, {transform_indices = @transform_1, window_bounds = array<i64: 2, 128>}, {transform_indices = @transform_2, window_bounds = array<i64: 2, 128>}]} {
    %c0 = arith.constant 0 : index
    %c0_0 = arith.constant 0 : index
    %0 = vector.load %arg2[%c0, %c0_0] : memref<2x128xf32, #tpu.memory_space<vmem>>, vector<2x128xf32>
    %c0_1 = arith.constant 0 : index
    %c0_2 = arith.constant 0 : index
    %1 = vector.load %arg1[%c0_1, %c0_2] : memref<1x128xf32, #tpu.memory_space<vmem>>, vector<1x128xf32>
    %2 = vector.broadcast %1 : vector<1x128xf32> to vector<2x128xf32>
    %3 = arith.mulf %0, %2 : vector<2x128xf32>
    %4 = tpu.iota {dimensions = array<i32: 1>} : vector<1x128xi32>
    %c31_i32 = arith.constant 31 : i32
    %5 = vector.broadcast %c31_i32 : i32 to vector<1x128xi32>
    %6 = arith.andi %4, %5 : vector<1x128xi32>
    %c16_i32 = arith.constant 16 : i32
    %7 = vector.broadcast %c16_i32 : i32 to vector<1x128xi32>
    %8 = arith.cmpi slt, %6, %7 : vector<1x128xi32>
    %9 = math.sin %3 : vector<2x128xf32>
    %10 = math.cos %3 : vector<2x128xf32>
    %11 = vector.shape_cast %8 : vector<1x128xi1> to vector<1x128xi1>
    %12 = vector.broadcast %11 : vector<1x128xi1> to vector<2x128xi1>
    %13 = arith.select %12, %9, %10 : vector<2x128xi1>, vector<2x128xf32>
    %c0_3 = arith.constant 0 : index
    %c0_4 = arith.constant 0 : index
    %14 = vector.load %arg3[%c0_3, %c0_4] : memref<2x128xf32, #tpu.memory_space<vmem>>, vector<2x128xf32>
    tpu.vector_store %arg3[%c0_3, %c0_4], %13 {strides = array<i32>} : memref<2x128xf32, #tpu.memory_space<vmem>>, vector<2x128xf32>,
    return
  }
  func.func @transform_0(%arg0: i32) -> (i32, i32) {
    %c0_i32 = arith.constant 0 : i32
    %c0_i32_0 = arith.constant 0 : i32
    %c0_i32_1 = arith.constant 0 : i32
    return %c0_i32, %c0_i32_0 : i32, i32
  }
  func.func @transform_1(%arg0: i32) -> (i32, i32) {
    %c0_i32 = arith.constant 0 : i32
    %c0_i32_0 = arith.constant 0 : i32
    return %arg0, %c0_i32 : i32, i32
  }
  func.func @transform_2(%arg0: i32) -> (i32, i32) {
    %c0_i32 = arith.constant 0 : i32
    %c0_i32_0 = arith.constant 0 : i32
    return %arg0, %c0_i32 : i32, i32
  }
}

</mosaic_0001>

<bundles_post_ra>
// kernel: tpu_custom_call.1
= control target key start
LH: loop header
LB: loop body
LE: loop exit
PB: predicated region body
PF: predicated region fallthrough
CT: control target
= control target key end

     0   :  { %7 = vsyncpa [#allocation3], 0  ;;  %s407_s0 = inlined_call_operand.hbm [shape: f32[1,128], index: 0, kind: input, shape index: {}]   ;;  %s408_s1 = inlined_call_operand.vmem [shape: f32[2,128], index: 1, kind: input, shape index: {}]   ;;  %s409_s2 = inlined_call_operand.hbm [shape: f32[2,128], index: 2, kind: output, shape index: {}]  }
   0x1   :  { %8 = vsyncpa [#allocation4], 0  ;;  %s336_s9 = smov [#allocation2]   ;;  %s288_s13 = scalar_lea.hbm %s407_s0, 16 }
   0x2   :  { %s15_s10 = sshll.u32 %s336_s9, 4  ;;  %p289_p0 = scmp.ne.s32.totalorder %s407_s0, %s288_s13  ;;  %s16_s10 = int_to_ptr.vmem [resolvable:$true] %s15_s10 }
   0x3   :  { %p292_p1 = scmp.lt.u32.totalorder %s288_s13, %s407_s0 }
   0x5   :  { %p294_p2 = pnand %p292_p1, %p289_p0 }
   0x7   :  { %297 = shalt.err (!%p294_p2)
}
   0x8   :  { %s298_s18 = scalar_lea.vmem %s16_s10, 16  ;;  %s302_s19 = scalar_lea.vmem %s16_s10, 32 }
   0x9   :  { %p299_p3 = scmp.ne.s32.totalorder %s16_s10, %s298_s18  ;;  %p303_p4 = scmp.lt.s32.totalorder %s16_s10, %s16_s10 }
   0xa   :  { %p304_p5 = scmp.lt.s32.totalorder %s302_s19, %s298_s18 }
   0xc   :  { %p305_p6 = por %p304_p5, %p303_p4 }
   0xe   :  { %p306_p7 = pnand %p305_p6, %p299_p3 }
  0x10   :  { %309 = shalt.err (!%p306_p7)
}
  0x11   :  { %18 = dma.hbm_to_vmem [thread:$0]  %s407_s0, 16, %s16_s10, [#allocation3]  }
  0x12   :  { %332 = dma.done.wait [#allocation3], 16  }
  0x13   :  { %333 = vsyncadd [#allocation3], 4294967280  ;;  %v24_v0 = vld [vmem:[%s408_s1] sm:$0x3]  ;;  %v263_v1 = vld [vmem:[#allocation2] ss:$0 sm:$0xff] }
  0x14   :  { %v374_v2 = vmul.f32 %v263_v1, %v24_v0  ;;  %v337_v14 = vmov 683565275   ;;  %v338_v16 = vmov 2475754826   ;;  %v339_v18 = vmov 2131351028  }
  0x15   :  { %v340_v20 = vmov 2102212464   ;;  %v341_v22 = vmov 920167782   ;;  %v342_v29 = vmov 1326507024  }
  0x16   :  { %v40_v3 = vand.u32 2139095040, %v374_v2  ;;  %v37_v5 = vand.u32 2147483647, %v374_v2  ;;  %vm39_vm7 = vcmp.lt.s32.totalorder %v374_v2, 0  ;;  %vm129_vm15 = vweird.f32 %v374_v2  ;;  %s343_s0 = smov [#allocation5]  }
  0x17   :  { %s254_s1 = sshll.u32 %s343_s0, 4  ;;  %s255_s1 = int_to_ptr.vmem [resolvable:$true] %s254_s1 }
  0x18   :  { %v41_v4 = vshrl.u32 %v40_v3, 23  ;;  %v44_v8 = vand.u32 8388607, %v37_v5  ;;  %vm38_vm8 = vcmp.le.f32.partialorder %v37_v5, 0.7853982  ;;  %s310_s24 = scalar_lea.vmem %s255_s1, 32  ;;  %p315_p9 = scmp.lt.s32.totalorder %s255_s1, %s255_s1 }
  0x19   :  { %p311_p8 = scmp.ne.s32.totalorder %s255_s1, %s310_s24  ;;  %p316_p10 = scmp.lt.s32.totalorder %s310_s24, %s310_s24 }
  0x1a   :  { %v264_v6 = vadd.s32 4294967169, %v41_v4  ;;  %v45_v11 = vor.u32 8388608, %v44_v8 }
  0x1b   :  { %p317_p11 = por %p316_p10, %p315_p9 }
  0x1c   :  { %v47_v7 = vadd.s32 1, %v264_v6  ;;  %v85_v31 = vshll.u32 %v45_v11, 8 }
  0x1d   :  { %p318_p12 = pnand %p317_p11, %p311_p8 }
  0x1e   :  { %vm48_vm0 = vcmp.gt.s32.totalorder %v47_v7, 0 }
  0x1f   :  { %v49_v9 = vsel %vm48_vm0, %v47_v7, 0 }
  0x20   :  { %v51_v10 = vand.u32 31, %v49_v9  ;;  %v50_v12 = vshrl.u32 %v49_v9, 5 }
  0x22   :  { %v52_v13 = vsub.s32 32, %v51_v10  ;;  %v54_v15 = vshll.u32 %v337_v14, %v51_v10  ;;  %v57_v17 = vshll.u32 %v338_v16, %v51_v10  ;;  %v60_v19 = vshll.u32 %v339_v18, %v51_v10 }
  0x23   :  { %v63_v21 = vshll.u32 %v340_v20, %v51_v10  ;;  %v66_v23 = vshll.u32 %v341_v22, %v51_v10  ;;  %vm69_vm1 = vcmp.lt.s32.totalorder %v50_v12, 1  ;;  %vm72_vm2 = vcmp.lt.s32.totalorder %v50_v12, 4 }
  0x24   :  { %v53_v24 = vshrl.u32 %v337_v14, %v52_v13  ;;  %v55_v25 = vshrl.u32 %v338_v16, %v52_v13  ;;  %v58_v26 = vshrl.u32 %v339_v18, %v52_v13  ;;  %v61_v27 = vshrl.u32 %v340_v20, %v52_v13 }
  0x25   :  { %v64_v28 = vshrl.u32 %v341_v22, %v52_v13  ;;  %v67_v30 = vshrl.u32 %v342_v29, %v52_v13  ;;  %vm70_vm3 = vcmp.lt.s32.totalorder %v50_v12, 2  ;;  %vm71_vm4 = vcmp.lt.s32.totalorder %v50_v12, 3 }
  0x26   :  { %v56_v32 = vor.u32 %v55_v25, %v54_v15  ;;  %v59_v33 = vor.u32 %v58_v26, %v57_v17  ;;  %v62_v34 = vor.u32 %v61_v27, %v60_v19  ;;  %v33_v22 = vlaneseq }
  0x27   :  { %v65_v35 = vor.u32 %v64_v28, %v63_v21  ;;  %v68_v36 = vor.u32 %v67_v30, %v66_v23 }
  0x28   :  { %v73_v37 = vsel %vm69_vm1, %v53_v24, %v56_v32  ;;  %v74_v38 = vsel %vm72_vm2, %v62_v34, 2102212464  ;;  %v77_v39 = vsel %vm69_vm1, %v56_v32, %v59_v33  ;;  %v81_v40 = vsel %vm69_vm1, %v59_v33, %v62_v34 }
  0x29   :  { %v75_v41 = vsel %vm71_vm4, %v59_v33, %v74_v38  ;;  %v78_v42 = vsel %vm72_vm2, %v65_v35, 920167782  ;;  %v82_v43 = vsel %vm72_vm2, %v68_v36, 1326507024  ;;  %v34_v24 = vand.u32 127, %v33_v22 }
  0x2a   :  { %v79_v44 = vsel %vm71_vm4, %v62_v34, %v78_v42  ;;  %v83_v45 = vsel %vm71_vm4, %v65_v35, %v82_v43  ;;  %v76_v46 = vsel %vm70_vm3, %v73_v37, %v75_v41 }
  0x2b   :  { %v80_v47 = vsel %vm70_vm3, %v77_v39, %v79_v44  ;;  %v84_v48 = vsel %vm70_vm3, %v81_v40, %v83_v45  ;;  %v92_v53 = vmul.u32 %v85_v31, %v76_v46  ;;  %v35_v28 = vand.u32 31, %v34_v24 }
  0x2c   :  { %v380_v49 = vmul.u32.u64.low %v85_v31, %v84_v48  ;;  %v381_v50 = vmul.u32.u64.high %v85_v31, %v84_v48, %v380_v49  ;;  %v383_v51 = vmul.u32.u64.low %v85_v31, %v80_v47  ;;  %v384_v52 = vmul.u32.u64.high %v85_v31, %v80_v47, %v383_v51 }
  0x2d   :  { %vm36_vm0 = vcmp.lt.s32.totalorder %v35_v28, 16 }
  0x2e   :  { %vm94_vm5 = vc.u32 %v381_v50, %v383_v51  ;;  %v95_v54 = vadd.s32 1, %v384_v52  ;;  %v93_v1 = vadd.s32 %v383_v51, %v381_v50 }
  0x30   :  { %v96_v55 = vsel %vm94_vm5, %v95_v54, %v384_v52 }
  0x31   :  { %v97_v56 = vadd.s32 %v96_v55, %v92_v53 }
  0x33   :  { %v98_v57 = vadd.s32 536870912, %v97_v56 }
  0x35   :  { %v99_v58 = vshrl.u32 %v98_v57, 30 }
  0x37   :  { %v100_v59 = vshll.u32 %v99_v58, 30  ;;  %v123_v15 = vsub.s32 4, %v99_v58 }
  0x39   :  { %v101_v60 = vsub.s32 %v97_v56, %v100_v59  ;;  %v124_v18 = vsel %vm39_vm7, %v123_v15, %v99_v58 }
  0x3a   :  { %v126_v21 = vsel %vm38_vm8, 0, %v124_v18 }
  0x3b   :  { %v103_v61 = vsub.s32 0, %v101_v60  ;;  %v130_v23 = vadd.s32 3, %v126_v21  ;;  %v234_v26 = vand.u32 3, %v126_v21 }
  0x3d   :  { %v265_v62 = vmin.u32 %v103_v61, %v101_v60  ;;  %v131_v25 = vand.u32 3, %v130_v23  ;;  %vm239_vm10 = vcmp.eq.s32.totalorder %v234_v26, 2  ;;  %vm236_vm12 = vcmp.eq.s32.totalorder %v234_v26, 0 }
  0x3e   :  { %vm235_vm14 = vcmp.lt.s32.totalorder %v234_v26, 2 }
  0x3f   :  { %v105_v63 = vclz %v265_v62  ;;  %vm136_vm9 = vcmp.eq.s32.totalorder %v131_v25, 2  ;;  %vm133_vm11 = vcmp.eq.s32.totalorder %v131_v25, 0  ;;  %vm132_vm13 = vcmp.lt.s32.totalorder %v131_v25, 2 }
  0x41   :  { %v266_v0 = vadd.s32 4294967294, %v105_v63 }
  0x43   :  { %vm267_vm6 = vcmp.lt.s32.totalorder %v266_v0, 0 }
  0x44   :  { %v108_v3 = vsel %vm267_vm6, 0, %v266_v0 }
  0x45   :  { %v109_v4 = vsub.s32 32, %v108_v3  ;;  %v110_v6 = vshll.u32 %v101_v60, %v108_v3  ;;  %v113_v7 = vsub.s32 4294967266, %v108_v3 }
  0x47   :  { %v111_v8 = vshrl.u32 %v93_v1, %v109_v4  ;;  %v114_v9 = vadd.s32 127, %v113_v7 }
  0x49   :  { %v112_v10 = vor.u32 %v111_v8, %v110_v6  ;;  %v115_v11 = vshll.u32 %v114_v9, 23 }
  0x4b   :  { %v116_v12 = vor.u32 4788187, %v115_v11  ;;  %v119_v13 = vcvt.s32.f32 %v112_v10 }
  0x4d   :  { %v117_v14 = vand.u32 2147483647, %v116_v12 }
  0x4f   :  { %v120_v16 = vmul.f32 %v119_v13, %v117_v14 }
  0x51   :  { %v121_v17 = vxor.u32 2147483648, %v120_v16 }
  0x53   :  { %v122_v19 = vsel %vm39_vm7, %v121_v17, %v120_v16 }
  0x54   :  { %v125_v20 = vsel %vm38_vm8, %v374_v2, %v122_v19 }
  0x55   :  { %284 = vcosq.f32 %v125_v20 }
  0x56   :  { %286 = vsinq.f32 %v125_v20 }
  0x5f   :  { %v285_v27 = vpop.eup %284 }
  0x60   :  { %v287_v29 = vpop.eup %286  ;;  %v137_v5 = vxor.u32 2147483648, %v285_v27 }
  0x61   :  { %v134_v30 = vxor.u32 2147483648, %v287_v29 }
  0x62   :  { %v138_v31 = vsel %vm136_vm9, %v137_v5, %v287_v29  ;;  %v241_v32 = vsel %vm239_vm10, %v137_v5, %v287_v29 }
  0x63   :  { %v135_v33 = vsel %vm133_vm11, %v285_v27, %v134_v30  ;;  %v238_v34 = vsel %vm236_vm12, %v285_v27, %v134_v30 }
  0x64   :  { %v139_v35 = vsel %vm132_vm13, %v135_v33, %v138_v31  ;;  %v242_v36 = vsel %vm235_vm14, %v238_v34, %v241_v32 }
  0x65   :  { %v140_v37 = vsel %vm129_vm15, nan, %v139_v35  ;;  %v243_v38 = vsel %vm129_vm15, nan, %v242_v36 }
  0x66   :  { %v246_v39 = vsel %vm36_vm0, %v140_v37, %v243_v38 }
  0x67   :  { %247 = vst [vmem:[#allocation5] sm:$0x3] %v246_v39 }
  0x68   :  { %321 = shalt.err (!%p318_p12)
}
  0x69   :  { %s322_s27 = scalar_lea.hbm %s409_s2, 32 }
  0x6a   :  { %p323_p13 = scmp.ne.s32.totalorder %s409_s2, %s322_s27  ;;  %p326_p0 = scmp.lt.u32.totalorder %s322_s27, %s409_s2 }
  0x6c   :  { %p328_p1 = pnand %p326_p0, %p323_p13 }
  0x6e   :  { %331 = shalt.err (!%p328_p1)
}
  0x6f   :  { %257 = dma.vmem_to_hbm [thread:$0]  %s255_s1, 32, %s409_s2, [#allocation4]  }
  0x70   :  { %334 = dma.done.wait [#allocation4], 32  }
  0x71   :  { %335 = vsyncadd [#allocation4], 4294967264 }
  0x72   :  { %261 = vsyncpa [#allocation3], 1 }
  0x73   :  { %262 = vsyncpa [#allocation4], 1 }

</bundles_post_ra>
